<compile_context>
chip_gen: v7x
topology: tpu7x:2x2x1
jax: 0.10.0
libtpu: 0.0.40
codegen_flags: <defaults>
</compile_context>

<pallas_src>
import functools
import math

import jax
import jax.numpy as jnp
from jax import lax
from jax.experimental import pallas as pl
from jax.experimental.pallas import tpu as pltpu


# ---------------------------------------------------------------------------
# Kernel
# ---------------------------------------------------------------------------

def _seg_reduce(v, reduce_fn, seg, nseg):
    """Per-row reduction over contiguous lane segments of width `seg`.

    nseg == 1  -> returns (rows, 1) (normal keepdims reduction).
    nseg  > 1  -> returns (rows, nseg*seg) with each segment's reduced value
                  broadcast back over that segment (static lane slices + concat,
                  all hidden under DMA for this HBM-bound kernel)."""
    if nseg == 1:
        return reduce_fn(v)
    parts = []
    for j in range(nseg):
        s = v[:, j * seg:(j + 1) * seg]
        parts.append(jnp.broadcast_to(reduce_fn(s), s.shape))
    return jnp.concatenate(parts, axis=-1)


def _layernorm_kernel(x_ref, g_ref, o_ref, *, eps, stable, seg, nseg):
    # x_ref : (TM, nseg*seg) rows (lane-dense), g_ref : (1, nseg*seg)
    x = x_ref[...].astype(jnp.float32)

    if stable:
        amax = _seg_reduce(x, lambda v: jnp.max(v, axis=-1, keepdims=True),
                           seg, nseg)
        # Divide via EUP reciprocal (free bundle slot); error cancels through
        # the subsequent mean/var/rsqrt normalization.
        x = x * pl.reciprocal(amax, approx=True)

    inv_d = jnp.float32(1.0 / seg)
    mean = _seg_reduce(x, lambda v: jnp.sum(v, axis=-1, keepdims=True),
                       seg, nseg) * inv_d
    xc = x - mean
    var = _seg_reduce(xc * xc, lambda v: jnp.sum(v, axis=-1, keepdims=True),
                      seg, nseg) * inv_d                    # unbiased=False
    inv = lax.rsqrt(var + jnp.float32(eps))                 # EUP slot

    o_ref[...] = (xc * inv * g_ref[...].astype(jnp.float32)).astype(o_ref.dtype)


# ---------------------------------------------------------------------------
# Tiling heuristics
# ---------------------------------------------------------------------------

_TARGET_BLOCK_BYTES = 2 * 1024 * 1024   # ~1-4 MiB blocks reach ~85%+ HBM roofline
_MIN_BLOCKS = 8                         # keep pipeline + v7x dual-TC sharding alive
_VMEM_LIMIT_BYTES = 48 * 1024 * 1024    # headroom under v7x's 64 MiB physical VMEM


def _row_granule(itemsize):
    # Sub-32-bit dtypes pack rows along sublanes; keep tm a multiple of the
    # packed sublane count to avoid masked-sublane layouts.
    if itemsize >= 4:
        return 8
    if itemsize == 2:
        return 16
    return 32


def _pick_row_tile(m, d_eff, itemsize):
    gran = _row_granule(itemsize)
    if m <= gran:
        return m  # tiny problem: single block equal to the full extent
    # ~2 MiB per block, rounded down to the sublane granule.
    tm = _TARGET_BLOCK_BYTES // max(1, d_eff * itemsize)
    tm = max(gran, (tm // gran) * gran)
    # Never let one block swallow all rows: keep >= ~_MIN_BLOCKS blocks so the
    # pipeline double-buffers and a megacore part can shard the grid.
    cap = max(gran, (pl.cdiv(m, _MIN_BLOCKS) // gran) * gran)
    return max(gran, min(tm, cap))


# ---------------------------------------------------------------------------
# Wrapper
# ---------------------------------------------------------------------------

def layernorm_forward(x, g, *, stable=False):
    """Pallas LayerNorm over the last dim.   x: (..., D),  g: (D,)"""
    orig_shape = x.shape
    d = orig_shape[-1]
    m = math.prod(orig_shape[:-1]) if len(orig_shape) > 1 else 1
    eps = 1e-5 if x.dtype == jnp.float32 else 1e-3

    x2 = x.reshape(m, d)
    g2 = g.reshape(1, d)

    # Lane packing for small D: fold 128//D rows into one 128-lane-dense row
    # (a free, layout-preserving reshape in HBM); the kernel then reduces per
    # lane segment. Avoids masked partial stores and 128/D-x lane waste.
    nseg = 1
    if d < 128 and d >= 8 and 128 % d == 0 and m % (128 // d) == 0:
        nseg = 128 // d
        x2 = x2.reshape(m // nseg, nseg * d)
        g2 = jnp.tile(g.reshape(1, d), (1, nseg))
    m_eff, d_eff = x2.shape

    itemsize = jnp.dtype(x.dtype).itemsize
    tm = _pick_row_tile(m_eff, d_eff, itemsize)
    grid = (pl.cdiv(m_eff, tm),)   # ragged last block is fine: reduction is over D

    kernel = functools.partial(_layernorm_kernel, eps=eps, stable=stable,
                               seg=d, nseg=nseg)

    out = pl.pallas_call(
        kernel,
        out_shape=jax.ShapeDtypeStruct((m_eff, d_eff), x.dtype),
        grid_spec=pltpu.PrefetchScalarGridSpec(
            num_scalar_prefetch=0,
            grid=grid,
            in_specs=[
                pl.BlockSpec((tm, d_eff), lambda i: (i, 0)),
                pl.BlockSpec((1, d_eff), lambda i: (0, 0)),
            ],
            out_specs=pl.BlockSpec((tm, d_eff), lambda i: (i, 0)),
        ),
        compiler_params=pltpu.CompilerParams(
            dimension_semantics=("parallel",),
            vmem_limit_bytes=_VMEM_LIMIT_BYTES),
    )(x2, g2)

    return out.reshape(orig_shape)


# ---------------------------------------------------------------------------
# Reference + self-test
# ---------------------------------------------------------------------------

def _reference(x, g, *, stable=False):
    """Plain-JAX reference mirroring the PyTorch module."""
    if stable:
        x = x / jnp.max(x, axis=-1, keepdims=True)
    eps = 1e-5 if x.dtype == jnp.float32 else 1e-3
    mean = jnp.mean(x, axis=-1, keepdims=True)
    var = jnp.mean((x - mean) ** 2, axis=-1, keepdims=True)  # unbiased=False
    return (x - mean) * lax.rsqrt(var + eps) * g


if __name__ == "__main__":
    key = jax.random.PRNGKey(0)
    k1, k2, k3 = jax.random.split(key, 3)

    # Shapes implied by the module: (batch, seq, hidden) with LayerNorm on hidden.
    B, S, D = 2, 8, 32
    x = jax.random.normal(k1, (B, S, D), jnp.float32)
    g = 1.0 + 0.1 * jax.random.normal(k2, (D,), jnp.float32)

    out = jax.block_until_ready(layernorm_forward(x, g, stable=False))
    ref = jax.block_until_ready(_reference(x, g, stable=False))
    assert out.shape == (B, S, D)
    assert jnp.allclose(out, ref, atol=1e-5, rtol=1e-5)

    # stable=True path (approx EUP reciprocal -> slightly looser tolerance).
    out_s = jax.block_until_ready(layernorm_forward(x, g, stable=True))
    ref_s = jax.block_until_ready(_reference(x, g, stable=True))
    assert jnp.allclose(out_s, ref_s, atol=2e-3, rtol=2e-3)

    # Secondary check: D multiple of 128 + ragged cdiv grid (M not divisible by tm).
    B2, S2, D2 = 4, 50, 256
    x2 = jax.random.normal(k3, (B2, S2, D2), jnp.float32)
    g2 = jnp.ones((D2,), jnp.float32)
    out2 = jax.block_until_ready(layernorm_forward(x2, g2, stable=False))
    ref2 = jax.block_until_ready(_reference(x2, g2, stable=False))
    assert out2.shape == (B2, S2, D2)
    assert jnp.allclose(out2, ref2, atol=1e-5, rtol=1e-5)

    print("KERNEL_OK")
</pallas_src>

<mosaic_0001>
module attributes {stable_mosaic.version = 11 : i64} {
  func.func @_layernorm_kernel(%arg0: i32, %arg1: memref<4x128xf32, #tpu.memory_space<vmem>>, %arg2: memref<1x128xf32, #tpu.memory_space<vmem>>, %arg3: memref<4x128xf32, #tpu.memory_space<vmem>>) attributes {dimension_semantics = [#tpu.dimension_semantics<parallel>], iteration_bounds = array<i64: 1>, scalar_prefetch = 0 : i64, scratch_operands = 0 : i64, tpu.core_type = #tpu.core_type<tc>, window_params = [{transform_indices = @transform_0, window_bounds = array<i64: 4, 128>}, {pipeline_mode = #tpu.pipeline_mode<synchronous>, transform_indices = @transform_1, window_bounds = array<i64: 1, 128>}, {transform_indices = @transform_2, window_bounds = array<i64: 4, 128>}]} {
    %c0 = arith.constant 0 : index
    %c0_0 = arith.constant 0 : index
    %0 = vector.load %arg1[%c0, %c0_0] : memref<4x128xf32, #tpu.memory_space<vmem>>, vector<4x128xf32>
    %1 = vector.extract_strided_slice %0 {offsets = [0, 0], sizes = [4, 32], strides = [1, 1]} : vector<4x128xf32> to vector<4x32xf32>
    %cst = arith.constant dense<0.000000e+00> : vector<4xf32>
    %2 = vector.multi_reduction <add>, %1, %cst [1] : vector<4x32xf32> to vector<4xf32>
    %3 = vector.shape_cast %2 : vector<4xf32> to vector<4x1xf32>
    %4 = vector.shape_cast %3 : vector<4x1xf32> to vector<4x1xf32>
    %5 = vector.broadcast %4 : vector<4x1xf32> to vector<4x32xf32>
    %6 = vector.extract_strided_slice %0 {offsets = [0, 32], sizes = [4, 32], strides = [1, 1]} : vector<4x128xf32> to vector<4x32xf32>
    %cst_1 = arith.constant dense<0.000000e+00> : vector<4xf32>
    %7 = vector.multi_reduction <add>, %6, %cst_1 [1] : vector<4x32xf32> to vector<4xf32>
    %8 = vector.shape_cast %7 : vector<4xf32> to vector<4x1xf32>
    %9 = vector.shape_cast %8 : vector<4x1xf32> to vector<4x1xf32>
    %10 = vector.broadcast %9 : vector<4x1xf32> to vector<4x32xf32>
    %11 = vector.extract_strided_slice %0 {offsets = [0, 64], sizes = [4, 32], strides = [1, 1]} : vector<4x128xf32> to vector<4x32xf32>
    %cst_2 = arith.constant dense<0.000000e+00> : vector<4xf32>
    %12 = vector.multi_reduction <add>, %11, %cst_2 [1] : vector<4x32xf32> to vector<4xf32>
    %13 = vector.shape_cast %12 : vector<4xf32> to vector<4x1xf32>
    %14 = vector.shape_cast %13 : vector<4x1xf32> to vector<4x1xf32>
    %15 = vector.broadcast %14 : vector<4x1xf32> to vector<4x32xf32>
    %16 = vector.extract_strided_slice %0 {offsets = [0, 96], sizes = [4, 32], strides = [1, 1]} : vector<4x128xf32> to vector<4x32xf32>
    %cst_3 = arith.constant dense<0.000000e+00> : vector<4xf32>
    %17 = vector.multi_reduction <add>, %16, %cst_3 [1] : vector<4x32xf32> to vector<4xf32>
    %18 = vector.shape_cast %17 : vector<4xf32> to vector<4x1xf32>
    %19 = vector.shape_cast %18 : vector<4x1xf32> to vector<4x1xf32>
    %20 = vector.broadcast %19 : vector<4x1xf32> to vector<4x32xf32>
    %21 = tpu.concatenate %5, %10, %15, %20 in 1 : vector<4x32xf32>, vector<4x32xf32>, vector<4x32xf32>, vector<4x32xf32> -> vector<4x128xf32>
    %cst_4 = arith.constant 3.125000e-02 : f32
    %22 = vector.broadcast %cst_4 : f32 to vector<4x128xf32>
    %23 = arith.mulf %21, %22 : vector<4x128xf32>
    %24 = arith.subf %0, %23 : vector<4x128xf32>
    %25 = arith.mulf %24, %24 : vector<4x128xf32>
    %26 = vector.extract_strided_slice %25 {offsets = [0, 0], sizes = [4, 32], strides = [1, 1]} : vector<4x128xf32> to vector<4x32xf32>
    %cst_5 = arith.constant dense<0.000000e+00> : vector<4xf32>
    %27 = vector.multi_reduction <add>, %26, %cst_5 [1] : vector<4x32xf32> to vector<4xf32>
    %28 = vector.shape_cast %27 : vector<4xf32> to vector<4x1xf32>
    %29 = vector.shape_cast %28 : vector<4x1xf32> to vector<4x1xf32>
    %30 = vector.broadcast %29 : vector<4x1xf32> to vector<4x32xf32>
    %31 = vector.extract_strided_slice %25 {offsets = [0, 32], sizes = [4, 32], strides = [1, 1]} : vector<4x128xf32> to vector<4x32xf32>
    %cst_6 = arith.constant dense<0.000000e+00> : vector<4xf32>
    %32 = vector.multi_reduction <add>, %31, %cst_6 [1] : vector<4x32xf32> to vector<4xf32>
    %33 = vector.shape_cast %32 : vector<4xf32> to vector<4x1xf32>
    %34 = vector.shape_cast %33 : vector<4x1xf32> to vector<4x1xf32>
    %35 = vector.broadcast %34 : vector<4x1xf32> to vector<4x32xf32>
    %36 = vector.extract_strided_slice %25 {offsets = [0, 64], sizes = [4, 32], strides = [1, 1]} : vector<4x128xf32> to vector<4x32xf32>
    %cst_7 = arith.constant dense<0.000000e+00> : vector<4xf32>
    %37 = vector.multi_reduction <add>, %36, %cst_7 [1] : vector<4x32xf32> to vector<4xf32>
    %38 = vector.shape_cast %37 : vector<4xf32> to vector<4x1xf32>
    %39 = vector.shape_cast %38 : vector<4x1xf32> to vector<4x1xf32>
    %40 = vector.broadcast %39 : vector<4x1xf32> to vector<4x32xf32>
    %41 = vector.extract_strided_slice %25 {offsets = [0, 96], sizes = [4, 32], strides = [1, 1]} : vector<4x128xf32> to vector<4x32xf32>
    %cst_8 = arith.constant dense<0.000000e+00> : vector<4xf32>
    %42 = vector.multi_reduction <add>, %41, %cst_8 [1] : vector<4x32xf32> to vector<4xf32>
    %43 = vector.shape_cast %42 : vector<4xf32> to vector<4x1xf32>
    %44 = vector.shape_cast %43 : vector<4x1xf32> to vector<4x1xf32>
    %45 = vector.broadcast %44 : vector<4x1xf32> to vector<4x32xf32>
    %46 = tpu.concatenate %30, %35, %40, %45 in 1 : vector<4x32xf32>, vector<4x32xf32>, vector<4x32xf32>, vector<4x32xf32> -> vector<4x128xf32>
    %cst_9 = arith.constant 3.125000e-02 : f32
    %47 = vector.broadcast %cst_9 : f32 to vector<4x128xf32>
    %48 = arith.mulf %46, %47 : vector<4x128xf32>
    %cst_10 = arith.constant 9.99999974E-6 : f32
    %49 = vector.broadcast %cst_10 : f32 to vector<4x128xf32>
    %50 = arith.addf %48, %49 : vector<4x128xf32>
    %51 = math.rsqrt %50 : vector<4x128xf32>
    %52 = arith.mulf %24, %51 : vector<4x128xf32>
    %c0_11 = arith.constant 0 : index
    %c0_12 = arith.constant 0 : index
    %53 = vector.load %arg2[%c0_11, %c0_12] : memref<1x128xf32, #tpu.memory_space<vmem>>, vector<1x128xf32>
    %54 = vector.broadcast %53 : vector<1x128xf32> to vector<4x128xf32>
    %55 = arith.mulf %52, %54 : vector<4x128xf32>
    %c0_13 = arith.constant 0 : index
    %c0_14 = arith.constant 0 : index
    %56 = vector.load %arg3[%c0_13, %c0_14] : memref<4x128xf32, #tpu.memory_space<vmem>>, vector<4x128xf32>
    tpu.vector_store %arg3[%c0_13, %c0_14], %55 {strides = array<i32>} : memref<4x128xf32, #tpu.memory_space<vmem>>, vector<4x128xf32>,
    return
  }
  func.func @transform_0(%arg0: i32) -> (i32, i32) {
    %c0_i32 = arith.constant 0 : i32
    %c0_i32_0 = arith.constant 0 : i32
    return %arg0, %c0_i32 : i32, i32
  }
  func.func @transform_1(%arg0: i32) -> (i32, i32) {
    %c0_i32 = arith.constant 0 : i32
    %c0_i32_0 = arith.constant 0 : i32
    %c0_i32_1 = arith.constant 0 : i32
    return %c0_i32, %c0_i32_0 : i32, i32
  }
  func.func @transform_2(%arg0: i32) -> (i32, i32) {
    %c0_i32 = arith.constant 0 : i32
    %c0_i32_0 = arith.constant 0 : i32
    return %arg0, %c0_i32 : i32, i32
  }
}

</mosaic_0001>

<bundles_post_ra>
// kernel: tpu_custom_call.1
= control target key start
LH: loop header
LB: loop body
LE: loop exit
PB: predicated region body
PF: predicated region fallthrough
CT: control target
= control target key end

     0   :  { %7 = vsyncpa [#allocation3], 0  ;;  %s231_s0 = inlined_call_operand.hbm [shape: f32[4,128], index: 0, kind: input, shape index: {}]   ;;  %s232_s1 = inlined_call_operand.vmem [shape: f32[1,128], index: 1, kind: input, shape index: {}]   ;;  %s233_s2 = inlined_call_operand.hbm [shape: f32[4,128], index: 2, kind: output, shape index: {}]  }
   0x1   :  { %8 = vsyncpa [#allocation4], 0  ;;  %s166_s9 = smov [#allocation2]   ;;  %s118_s13 = scalar_lea.hbm %s231_s0, 64 }
   0x2   :  { %s15_s10 = sshll.u32 %s166_s9, 4  ;;  %p119_p0 = scmp.ne.s32.totalorder %s231_s0, %s118_s13  ;;  %s16_s10 = int_to_ptr.vmem [resolvable:$true] %s15_s10 }
   0x3   :  { %p122_p1 = scmp.lt.u32.totalorder %s118_s13, %s231_s0 }
   0x5   :  { %p124_p2 = pnand %p122_p1, %p119_p0 }
   0x7   :  { %127 = shalt.err (!%p124_p2)
}
   0x8   :  { %s128_s18 = scalar_lea.vmem %s16_s10, 64  ;;  %p133_p4 = scmp.lt.s32.totalorder %s16_s10, %s16_s10 }
   0x9   :  { %p129_p3 = scmp.ne.s32.totalorder %s16_s10, %s128_s18  ;;  %p134_p5 = scmp.lt.s32.totalorder %s128_s18, %s128_s18 }
   0xb   :  { %p135_p6 = por %p134_p5, %p133_p4 }
   0xd   :  { %p136_p7 = pnand %p135_p6, %p129_p3 }
   0xf   :  { %139 = shalt.err (!%p136_p7)
}
  0x10   :  { %18 = dma.hbm_to_vmem [thread:$0]  %s231_s0, 64, %s16_s10, [#allocation3]  }
  0x11   :  { %162 = dma.done.wait [#allocation3], 64  }
  0x12   :  { %163 = vsyncadd [#allocation3], 4294967232  ;;  %v24_v0 = vld [vmem:[#allocation2] sm:$0xf]  ;;  %s167_s21 = smov 96   ;;  %s168_s22 = smov 32  }
  0x13   :  { %30 = vrot.lane.b32.xlu0 %v24_v0, %s167_s21  ;;  %42 = vrot.lane.b32.xlu1 %v24_v0, %s168_s22  ;;  %s169_s23 = smov 64   ;;  %vm25_vm0 = vcmask 257024   ;;  %vm48_vm1 = vcmask 261120   ;;  %vm50_vm2 = vcmask 523264   ;;  %vm52_vm3 = vcmask 785408   ;;  %s170_s25 = smov [#allocation5]  }
  0x14   :  { %v26_v1 = vsel %vm25_vm0, %v24_v0, 0.0  ;;  %v110_v35 = vld [vmem:[%s232_s1] ss:$0 sm:$0xff]  ;;  %s101_s26 = sshll.u32 %s170_s25, 4  ;;  %s102_s26 = int_to_ptr.vmem [resolvable:$true] %s101_s26 }
  0x15   :  { %s140_s27 = scalar_lea.vmem %s102_s26, 64  ;;  %p145_p9 = scmp.lt.s32.totalorder %s102_s26, %s102_s26 }
  0x16   :  { %p141_p8 = scmp.ne.s32.totalorder %s102_s26, %s140_s27  ;;  %p146_p10 = scmp.lt.s32.totalorder %s140_s27, %s140_s27 }
  0x17   :  { %36 = vrot.lane.b32.xlu0 %v24_v0, %s169_s23 }
  0x18   :  { %p147_p11 = por %p146_p10, %p145_p9 }
  0x1a   :  { %p148_p12 = pnand %p147_p11, %p141_p8 }
  0x37   :  { %27 = vadd.xlane.f32.xlu1 %v26_v1 }
  0x85   :  { %v31_v2 = vpop.permute.xlu0 %30  ;;  %v43_v3 = vpop.permute.xlu1 %42 }
  0x86   :  { %v33_v4 = vsel %vm25_vm0, %v31_v2, 0.0  ;;  %v45_v5 = vsel %vm25_vm0, %v43_v3, 0.0 }
  0x87   :  { %34 = vadd.xlane.f32.xlu0 %v33_v4  ;;  %46 = vadd.xlane.f32.xlu1 %v45_v5 }
  0x89   :  { %v37_v6 = vpop.permute.xlu0 %36 }
  0x8a   :  { %v39_v7 = vsel %vm25_vm0, %v37_v6, 0.0 }
  0x8b   :  { %40 = vadd.xlane.f32.xlu0 %v39_v7 }
  0xc4   :  { %v28_v8 = vpop.xlane.xlu1 %27 }
 0x114   :  { %v35_v9 = vpop.xlane.xlu0 %34  ;;  %v47_v10 = vpop.xlane.xlu1 %46 }
 0x115   :  { %v49_v11 = vsel %vm48_vm1, %v28_v8, %v35_v9 }
 0x118   :  { %v41_v12 = vpop.xlane.xlu0 %40 }
 0x119   :  { %v51_v13 = vsel %vm50_vm2, %v49_v11, %v41_v12 }
 0x11a   :  { %v53_v14 = vsel %vm52_vm3, %v51_v13, %v47_v10 }
 0x11b   :  { %v54_v15 = vmul.f32 0.03125, %v53_v14 }
 0x11d   :  { %v55_v16 = vsub.f32 %v24_v0, %v54_v15 }
 0x11f   :  { %v56_v17 = vmul.f32 %v55_v16, %v55_v16 }
 0x121   :  { %67 = vrot.lane.b32.xlu1 %v56_v17, %s169_s23  ;;  %61 = vrot.lane.b32.xlu0 %v56_v17, %s167_s21  ;;  %v57_v18 = vsel %vm25_vm0, %v56_v17, 0.0 }
 0x125   :  { %73 = vrot.lane.b32.xlu1 %v56_v17, %s168_s22 }
 0x140   :  { %58 = vadd.xlane.f32.xlu0 %v57_v18 }
 0x193   :  { %v68_v19 = vpop.permute.xlu1 %67  ;;  %v62_v20 = vpop.permute.xlu0 %61 }
 0x194   :  { %v64_v21 = vsel %vm25_vm0, %v62_v20, 0.0  ;;  %v70_v22 = vsel %vm25_vm0, %v68_v19, 0.0 }
 0x195   :  { %65 = vadd.xlane.f32.xlu1 %v64_v21  ;;  %71 = vadd.xlane.f32.xlu0 %v70_v22 }
 0x197   :  { %v74_v23 = vpop.permute.xlu1 %73 }
 0x198   :  { %v76_v24 = vsel %vm25_vm0, %v74_v23, 0.0 }
 0x199   :  { %77 = vadd.xlane.f32.xlu0 %v76_v24 }
 0x1cd   :  { %v59_v25 = vpop.xlane.xlu0 %58 }
 0x222   :  { %v66_v26 = vpop.xlane.xlu1 %65  ;;  %v72_v27 = vpop.xlane.xlu0 %71 }
 0x223   :  { %v79_v28 = vsel %vm48_vm1, %v59_v25, %v66_v26 }
 0x224   :  { %v80_v29 = vsel %vm50_vm2, %v79_v28, %v72_v27 }
 0x226   :  { %v78_v30 = vpop.xlane.xlu0 %77 }
 0x227   :  { %v81_v31 = vsel %vm52_vm3, %v80_v29, %v78_v30 }
 0x228   :  { %v82_v32 = vmul.f32 0.03125, %v81_v31 }
 0x22a   :  { %v83_v33 = vadd.f32 1e-05, %v82_v32 }
 0x22c   :  { %116 = vrsqrt.f32 %v83_v33 }
 0x236   :  { %v117_v34 = vpop.eup %116 }
 0x237   :  { %v85_v36 = vmul.f32 %v117_v34, %v55_v16 }
 0x239   :  { %v93_v37 = vmul.f32 %v110_v35, %v85_v36 }
 0x23b   :  { %94 = vst [vmem:[#allocation5] sm:$0xf] %v93_v37 }
 0x23c   :  { %151 = shalt.err (!%p148_p12)
}
 0x23d   :  { %s152_s30 = scalar_lea.hbm %s233_s2, 64 }
 0x23e   :  { %p153_p13 = scmp.ne.s32.totalorder %s233_s2, %s152_s30  ;;  %p156_p0 = scmp.lt.u32.totalorder %s152_s30, %s233_s2 }
 0x240   :  { %p158_p1 = pnand %p156_p0, %p153_p13 }
 0x242   :  { %161 = shalt.err (!%p158_p1)
}
 0x243   :  { %104 = dma.vmem_to_hbm [thread:$0]  %s102_s26, 64, %s233_s2, [#allocation4]  }
 0x244   :  { %164 = dma.done.wait [#allocation4], 64  }
 0x245   :  { %165 = vsyncadd [#allocation4], 4294967232 }
 0x246   :  { %108 = vsyncpa [#allocation3], 1 }
 0x247   :  { %109 = vsyncpa [#allocation4], 1 }

</bundles_post_ra>
